<compile_context>
chip_gen: v7x
topology: tpu7x:2x2x1
jax: 0.10.0
libtpu: 0.0.40
codegen_flags: <defaults>
</compile_context>

<pallas_src>
import math

import jax
import jax.numpy as jnp
from jax.experimental import pallas as pl
from jax.experimental.pallas import tpu as pltpu


# ------------------------------ kernel ------------------------------------ #

def base_model_kernel(x_ref, adj_ref, prm_ref, mix_ref, out_ref):
    """Fused v/p encoder + readout (single invocation, no grid).

    x_ref   : [S, FA]       bf16  stacked node features (v rows then p rows),
                                  trailing ones column folds the init bias.
    adj_ref : [S, S]        bf16  block-diagonal normalized adjacency.
    prm_ref : [PR, 2D]      bf16  parameter slab:
                                  rows [0:FA]        W0 (block-diag, + bias row)
                                  rows [FA:FA+2D]    W1 (block-diag)
                                  rows [FA+2D:FA+4D] W2 (block-diag)
                                  row  FA+4D         GCN bias 1   [bv1 | bp1]
                                  row  FA+4D+1       GCN bias 2   [bv2 | bp2]
    mix_ref : [NP, NP+2NV]  bf16  readout matrix [p_mean | M | sel],
                                  M = gvp + sel + sel @ v_mean.
    out_ref : [NP, D]       f32   per-physical-node output embedding.
    """
    f32, bf16 = jnp.float32, jnp.bfloat16
    S, FA = x_ref.shape
    D2 = prm_ref.shape[1]
    D = D2 // 2
    NP = mix_ref.shape[0]
    NV = (mix_ref.shape[1] - NP) // 2
    r1, r2, rb = FA, FA + D2, FA + 2 * D2

    x = x_ref[...]                       # bf16 [S, FA]
    adj = adj_ref[...]                   # bf16 [S, S]
    w0 = prm_ref[0:FA, :]                # bf16 [FA, 2D]
    w1 = prm_ref[r1:r2, :]               # bf16 [2D, 2D]
    w2 = prm_ref[r2:rb, :]               # bf16 [2D, 2D]
    b1 = prm_ref[rb:rb + 1, :].astype(f32)       # [1, 2D]
    b2 = prm_ref[rb + 1:rb + 2, :].astype(f32)   # [1, 2D]

    # init = x @ W0 + b0 (bias folded via the ones column of x)
    init = jnp.dot(x, w0, preferred_element_type=f32)            # [S, 2D] f32

    # GCNConv 1 + ReLU:  h = relu(A_norm @ (init @ W1) + b1)
    h = jnp.dot(init.astype(bf16), w1, preferred_element_type=f32)
    h = jnp.dot(adj, h.astype(bf16), preferred_element_type=f32) + b1
    h = jnp.maximum(h, 0.0)

    # GCNConv 2 (no activation on the last layer)
    h = jnp.dot(h.astype(bf16), w2, preferred_element_type=f32)
    h = jnp.dot(adj, h.astype(bf16), preferred_element_type=f32) + b2

    # Readout in ONE matmul:
    #   out = h_p + init_p + [p_mean | M | sel] @ [h_p ; h_v ; init_v]
    #     p_mean @ h_p    : p-graph mean pooling broadcast onto p nodes
    #     M      @ h_v    : v_graph (x2, once inside v_dense) + curr-node h part
    #     sel    @ init_v : curr-node init part
    h_p = h[NV:, D:]                     # [NP, D] f32
    init_p = init[NV:, D:]               # [NP, D] f32
    vcat = jnp.concatenate(
        [h_p, h[:NV, :D], init[:NV, :D]], axis=0).astype(bf16)   # [NP+2NV, D]
    contrib = jnp.dot(mix_ref[...], vcat, preferred_element_type=f32)
    out_ref[...] = h_p + init_p + contrib


# ------------------------------ wrapper ------------------------------------ #

def normalize_adj(adj):
    """GCNConv normalization: D^{-1/2} (A + I) D^{-1/2}."""
    n = adj.shape[-1]
    a_hat = adj + jnp.eye(n, dtype=adj.dtype)
    deg = jnp.sum(a_hat, axis=-1)
    d_inv_sqrt = 1.0 / jnp.sqrt(deg)
    return a_hat * d_inv_sqrt[..., :, None] * d_inv_sqrt[..., None, :]


@jax.jit
def base_model_forward(curr_v_node_id, v_x, v_adj_norm, p_x, p_adj_norm, params):
    f32, bf16 = jnp.float32, jnp.bfloat16
    B, Nv, Fv = v_x.shape
    _, Np, Fp = p_x.shape
    D = params["wv1"].shape[-1]          # embedding_dim (128 -> lane-dense)
    D2 = 2 * D
    NV, NP = B * Nv, B * Np
    S = NV + NP
    # features + ones column, padded to a bf16 sublane tile (16 rows)
    FA = ((Fv + Fp + 1 + 15) // 16) * 16

    # ---- fused node features (v rows then p rows) + ones column ------------
    x_aug = jnp.zeros((S, FA), f32)
    x_aug = x_aug.at[:NV, :Fv].set(v_x.reshape(NV, Fv).astype(f32))
    x_aug = x_aug.at[NV:, Fv:Fv + Fp].set(p_x.reshape(NP, Fp).astype(f32))
    x_aug = x_aug.at[:, Fv + Fp].set(1.0)

    # ---- block-diagonal normalized adjacency over all graphs ---------------
    adj = jnp.zeros((S, S), f32)
    for b in range(B):
        adj = adj.at[b * Nv:(b + 1) * Nv,
                     b * Nv:(b + 1) * Nv].set(v_adj_norm[b].astype(f32))
        adj = adj.at[NV + b * Np:NV + (b + 1) * Np,
                     NV + b * Np:NV + (b + 1) * Np].set(p_adj_norm[b].astype(f32))

    # ---- one parameter slab: W0(+b0) | W1 | W2 | b1 | b2 --------------------
    r1, r2, rb = FA, FA + D2, FA + 2 * D2
    PR = rb + 16
    prm = jnp.zeros((PR, D2), f32)
    prm = prm.at[:Fv, :D].set(params["wv0"])
    prm = prm.at[Fv:Fv + Fp, D:].set(params["wp0"])
    prm = prm.at[Fv + Fp, :D].set(params["bv0"].reshape(D))
    prm = prm.at[Fv + Fp, D:].set(params["bp0"].reshape(D))
    prm = prm.at[r1:r1 + D, :D].set(params["wv1"])
    prm = prm.at[r1 + D:r2, D:].set(params["wp1"])
    prm = prm.at[r2:r2 + D, :D].set(params["wv2"])
    prm = prm.at[r2 + D:rb, D:].set(params["wp2"])
    prm = prm.at[rb, :D].set(params["bv1"].reshape(D))
    prm = prm.at[rb, D:].set(params["bp1"].reshape(D))
    prm = prm.at[rb + 1, :D].set(params["bv2"].reshape(D))
    prm = prm.at[rb + 1, D:].set(params["bp2"].reshape(D))

    # ---- readout mixing matrix [p_mean | M | sel] ---------------------------
    g_v = jnp.repeat(jnp.arange(B, dtype=jnp.int32), Nv)
    g_p = jnp.repeat(jnp.arange(B, dtype=jnp.int32), Np)
    p_mean = (g_p[:, None] == g_p[None, :]).astype(f32) / Np      # [NP, NP]
    gvp = (g_p[:, None] == g_v[None, :]).astype(f32) / Nv         # [NP, NV]
    v_mean = (g_v[:, None] == g_v[None, :]).astype(f32) / Nv      # [NV, NV]
    tgt = curr_v_node_id.astype(jnp.int32) + jnp.arange(B, dtype=jnp.int32) * Nv
    sel = (jnp.arange(NV, dtype=jnp.int32)[None, :]
           == tgt[g_p][:, None]).astype(f32)                      # [NP, NV]
    mix = jnp.concatenate([p_mean, gvp + sel + sel @ v_mean, sel], axis=1)

    # bf16 matmul inputs (f32 accumulation in-kernel)
    operands = (x_aug.astype(bf16), adj.astype(bf16),
                prm.astype(bf16), mix.astype(bf16))

    vmem = pl.BlockSpec(memory_space=pltpu.MemorySpace.VMEM)
    out = pl.pallas_call(
        base_model_kernel,
        out_shape=jax.ShapeDtypeStruct((NP, D), f32),
        in_specs=[vmem] * len(operands),
        out_specs=vmem,
        compiler_params=pltpu.CompilerParams(vmem_limit_bytes=32 * 1024 * 1024),
    )(*operands)

    return out.reshape(B, Np, D)


# pure-JAX f32 reference (same math as the PyTorch forward) for correctness
def _reference(curr_v_node_id, v_x, v_adj_norm, p_x, p_adj_norm, params):
    def enc(x, a, w0, b0, w1, b1, w2, b2):
        init = x @ w0 + b0
        h = jnp.maximum(jnp.einsum("bij,bjd->bid", a, init @ w1) + b1, 0.0)
        h = jnp.einsum("bij,bjd->bid", a, h @ w2) + b2
        g = jnp.mean(h, axis=1)
        return g, h + g[:, None, :] + init

    vg, vd = enc(v_x, v_adj_norm, params["wv0"], params["bv0"],
                 params["wv1"], params["bv1"], params["wv2"], params["bv2"])
    _pg, pd = enc(p_x, p_adj_norm, params["wp0"], params["bp0"],
                  params["wp1"], params["bp1"], params["wp2"], params["bp2"])
    idx = curr_v_node_id.astype(jnp.int32)[:, None, None]
    curr = jnp.take_along_axis(
        vd, jnp.broadcast_to(idx, (vd.shape[0], 1, vd.shape[-1])), axis=1)[:, 0, :]
    return pd + vg[:, None, :] + curr[:, None, :]


# ------------------------------ main --------------------------------------- #

def _uniform_init(key, shape):
    # matches BaseModel._init_parameters: uniform(-stdv, stdv), stdv=1/sqrt(fan)
    stdv = 1.0 / math.sqrt(shape[0])
    return jax.random.uniform(key, shape, jnp.float32, -stdv, stdv)


if __name__ == "__main__":
    B = 2            # batch of (v_net, p_net) observation pairs
    Nv, Fv = 8, 6    # virtual network: nodes, node-feature dim
    Np, Fp = 16, 5   # physical network: nodes, node-feature dim
    D = 128          # embedding_dim (module default; lane-dense output)

    key = jax.random.PRNGKey(0)
    ks = jax.random.split(key, 17)

    def _bias(k):
        # the real module initializes biases to 0.0; small nonzero values here
        # exercise the folded-bias / stacked-bias paths of the kernel
        return jax.random.uniform(k, (1, D), jnp.float32, -0.05, 0.05)

    params = {
        "wv0": _uniform_init(ks[0], (Fv, D)), "bv0": _bias(ks[11]),
        "wv1": _uniform_init(ks[1], (D, D)),  "bv1": _bias(ks[12]),
        "wv2": _uniform_init(ks[2], (D, D)),  "bv2": _bias(ks[13]),
        "wp0": _uniform_init(ks[3], (Fp, D)), "bp0": _bias(ks[14]),
        "wp1": _uniform_init(ks[4], (D, D)),  "bp1": _bias(ks[15]),
        "wp2": _uniform_init(ks[5], (D, D)),  "bp2": _bias(ks[16]),
    }

    v_x = jax.random.normal(ks[6], (B, Nv, Fv), jnp.float32)
    p_x = jax.random.normal(ks[7], (B, Np, Fp), jnp.float32)
    v_adj = (jax.random.uniform(ks[8], (B, Nv, Nv)) > 0.5).astype(jnp.float32)
    p_adj = (jax.random.uniform(ks[9], (B, Np, Np)) > 0.5).astype(jnp.float32)
    v_adj = jnp.maximum(v_adj, jnp.swapaxes(v_adj, -1, -2))   # symmetrize
    p_adj = jnp.maximum(p_adj, jnp.swapaxes(p_adj, -1, -2))
    v_adj_norm = normalize_adj(v_adj)
    p_adj_norm = normalize_adj(p_adj)

    curr_v_node_id = jax.random.randint(ks[10], (B,), 0, Nv, jnp.int32)

    out = base_model_forward(curr_v_node_id, v_x, v_adj_norm, p_x, p_adj_norm, params)
    out = jax.block_until_ready(out)

    ref = _reference(curr_v_node_id, v_x, v_adj_norm, p_x, p_adj_norm, params)
    assert out.shape == (B, Np, D)
    # bf16 matmul inputs (f32 accumulation) vs the pure-f32 reference
    assert jnp.allclose(out, ref, atol=5e-2, rtol=5e-2), \
        float(jnp.max(jnp.abs(out - ref)))

    print("KERNEL_OK")
</pallas_src>

<mosaic_0001>
module attributes {stable_mosaic.version = 11 : i64} {
  func.func @base_model_kernel(%arg0: memref<48x16xbf16, #tpu.memory_space<vmem>>, %arg1: memref<48x48xbf16, #tpu.memory_space<vmem>>, %arg2: memref<544x256xbf16, #tpu.memory_space<vmem>>, %arg3: memref<32x64xbf16, #tpu.memory_space<vmem>>, %arg4: memref<32x128xf32, #tpu.memory_space<vmem>>) attributes {dimension_semantics = [], scalar_prefetch = 0 : i64, scratch_operands = 0 : i64, tpu.core_type = #tpu.core_type<tc>} {
    %c0 = arith.constant 0 : index
    %c0_0 = arith.constant 0 : index
    %0 = vector.load %arg0[%c0, %c0_0] : memref<48x16xbf16, #tpu.memory_space<vmem>>, vector<48x16xbf16>
    %c0_1 = arith.constant 0 : index
    %c0_2 = arith.constant 0 : index
    %1 = vector.load %arg1[%c0_1, %c0_2] : memref<48x48xbf16, #tpu.memory_space<vmem>>, vector<48x48xbf16>
    %c0_3 = arith.constant 0 : index
    %c0_4 = arith.constant 0 : index
    %2 = vector.load %arg2[%c0_3, %c0_4] : memref<544x256xbf16, #tpu.memory_space<vmem>>, vector<16x256xbf16>
    %c16 = arith.constant 16 : index
    %c0_5 = arith.constant 0 : index
    %3 = vector.load %arg2[%c16, %c0_5] : memref<544x256xbf16, #tpu.memory_space<vmem>>, vector<256x256xbf16>
    %c272 = arith.constant 272 : index
    %c0_6 = arith.constant 0 : index
    %4 = vector.load %arg2[%c272, %c0_6] : memref<544x256xbf16, #tpu.memory_space<vmem>>, vector<256x256xbf16>
    %c528 = arith.constant 528 : index
    %c0_7 = arith.constant 0 : index
    %5 = vector.load %arg2[%c528, %c0_7] : memref<544x256xbf16, #tpu.memory_space<vmem>>, vector<1x256xbf16>
    %6 = arith.extf %5 : vector<1x256xbf16> to vector<1x256xf32>
    %c529 = arith.constant 529 : index
    %c0_8 = arith.constant 0 : index
    %7 = vector.load %arg2[%c529, %c0_8] : memref<544x256xbf16, #tpu.memory_space<vmem>>, vector<1x256xbf16>
    %8 = arith.extf %7 : vector<1x256xbf16> to vector<1x256xf32>
    %cst = arith.constant dense<0.000000e+00> : vector<48x256xf32>
    %9 = tpu.matmul %0, %2, %cst {dimension_numbers = #tpu.dot_dimension_numbers<[1], [0], [0], [1], [0, 0, 1, 1], [], []>} : vector<48x16xbf16>, vector<16x256xbf16>, vector<48x256xf32> -> vector<48x256xf32>
    %10 = arith.truncf %9 : vector<48x256xf32> to vector<48x256xbf16>
    %cst_9 = arith.constant dense<0.000000e+00> : vector<48x256xf32>
    %11 = tpu.matmul %10, %3, %cst_9 {dimension_numbers = #tpu.dot_dimension_numbers<[1], [0], [0], [1], [0, 0, 1, 1], [], []>} : vector<48x256xbf16>, vector<256x256xbf16>, vector<48x256xf32> -> vector<48x256xf32>
    %12 = arith.truncf %11 : vector<48x256xf32> to vector<48x256xbf16>
    %cst_10 = arith.constant dense<0.000000e+00> : vector<48x256xf32>
    %13 = tpu.matmul %1, %12, %cst_10 {dimension_numbers = #tpu.dot_dimension_numbers<[1], [0], [0], [1], [0, 0, 1, 1], [], []>} : vector<48x48xbf16>, vector<48x256xbf16>, vector<48x256xf32> -> vector<48x256xf32>
    %14 = vector.broadcast %6 : vector<1x256xf32> to vector<48x256xf32>
    %15 = arith.addf %13, %14 : vector<48x256xf32>
    %cst_11 = arith.constant 0.000000e+00 : f32
    %16 = vector.broadcast %cst_11 : f32 to vector<48x256xf32>
    %17 = arith.maximumf %15, %16 : vector<48x256xf32>
    %18 = arith.truncf %17 : vector<48x256xf32> to vector<48x256xbf16>
    %cst_12 = arith.constant dense<0.000000e+00> : vector<48x256xf32>
    %19 = tpu.matmul %18, %4, %cst_12 {dimension_numbers = #tpu.dot_dimension_numbers<[1], [0], [0], [1], [0, 0, 1, 1], [], []>} : vector<48x256xbf16>, vector<256x256xbf16>, vector<48x256xf32> -> vector<48x256xf32>
    %20 = arith.truncf %19 : vector<48x256xf32> to vector<48x256xbf16>
    %cst_13 = arith.constant dense<0.000000e+00> : vector<48x256xf32>
    %21 = tpu.matmul %1, %20, %cst_13 {dimension_numbers = #tpu.dot_dimension_numbers<[1], [0], [0], [1], [0, 0, 1, 1], [], []>} : vector<48x48xbf16>, vector<48x256xbf16>, vector<48x256xf32> -> vector<48x256xf32>
    %22 = vector.broadcast %8 : vector<1x256xf32> to vector<48x256xf32>
    %23 = arith.addf %21, %22 : vector<48x256xf32>
    %24 = vector.extract_strided_slice %23 {offsets = [16, 128], sizes = [32, 128], strides = [1, 1]} : vector<48x256xf32> to vector<32x128xf32>
    %25 = vector.extract_strided_slice %9 {offsets = [16, 128], sizes = [32, 128], strides = [1, 1]} : vector<48x256xf32> to vector<32x128xf32>
    %26 = vector.extract_strided_slice %23 {offsets = [0, 0], sizes = [16, 128], strides = [1, 1]} : vector<48x256xf32> to vector<16x128xf32>
    %27 = vector.extract_strided_slice %9 {offsets = [0, 0], sizes = [16, 128], strides = [1, 1]} : vector<48x256xf32> to vector<16x128xf32>
    %28 = tpu.concatenate %24, %26, %27 in 0 : vector<32x128xf32>, vector<16x128xf32>, vector<16x128xf32> -> vector<64x128xf32>
    %29 = arith.truncf %28 : vector<64x128xf32> to vector<64x128xbf16>
    %c0_14 = arith.constant 0 : index
    %c0_15 = arith.constant 0 : index
    %30 = vector.load %arg3[%c0_14, %c0_15] : memref<32x64xbf16, #tpu.memory_space<vmem>>, vector<32x64xbf16>
    %cst_16 = arith.constant dense<0.000000e+00> : vector<32x128xf32>
    %31 = tpu.matmul %30, %29, %cst_16 {dimension_numbers = #tpu.dot_dimension_numbers<[1], [0], [0], [1], [0, 0, 1, 1], [], []>} : vector<32x64xbf16>, vector<64x128xbf16>, vector<32x128xf32> -> vector<32x128xf32>
    %32 = arith.addf %24, %25 : vector<32x128xf32>
    %33 = arith.addf %32, %31 : vector<32x128xf32>
    %c0_17 = arith.constant 0 : index
    %c0_18 = arith.constant 0 : index
    %34 = vector.load %arg4[%c0_17, %c0_18] : memref<32x128xf32, #tpu.memory_space<vmem>>, vector<32x128xf32>
    tpu.vector_store %arg4[%c0_17, %c0_18], %33 {strides = array<i32>} : memref<32x128xf32, #tpu.memory_space<vmem>>, vector<32x128xf32>,
    return
  }
}

</mosaic_0001>

<bundles_post_ra>
// kernel: eq.39
= control target key start
LH: loop header
LB: loop body
LE: loop exit
PB: predicated region body
PF: predicated region fallthrough
CT: control target
= control target key end

     0   :  { %vm7_vm0 = vcmask 64512   ;;  %vm13_vm1 = vcmask 130112   ;;  %s39_s0 = inlined_call_operand.vmem [shape: s32[2,8], index: 0, kind: input, shape index: {}]   ;;  %s40_s1 = inlined_call_operand.vmem [shape: s32[16], index: 1, kind: output, shape index: {}]  }
   0x1   :  { %v4_v0 = vld [vmem:[%s39_s0] sm:$0x3]  ;;  %s22_s0 = smov 8  }
   0x2   :  { %5 = vst [vmem:[#allocation1] sm:$0x3] %v4_v0 }
   0x9   :  { %v10_v1 = vld [vmem:[#allocation1 + $0x1] sm:$0x1]   ;;  %v6_v2 = vld [vmem:[#allocation1] sm:$0x1]  }
   0xa   :  { %11 = vrot.lane.b32.xlu0 %v10_v1, %s22_s0  ;;  %8 = vst.msk [vmem:[#allocation0] sm:$0x1] %vm7_vm0, %v6_v2  }
  0x7c   :  { %v12_v3 = vpop.permute.xlu0 %11  }
  0x7d   :  { %14 = vst.msk [vmem:[#allocation0] sm:$0x1] %vm13_vm1, %v12_v3  }
  0x84   :  { %v18_v4 = vld [vmem:[#allocation0] sm:$0x1] }
  0x85   :  { %20 = vst [vmem:[%s40_s1] sm:$0x1] %v18_v4 }

// kernel: eq.29
= control target key start
LH: loop header
LB: loop body
LE: loop exit
PB: predicated region body
PF: predicated region fallthrough
CT: control target
= control target key end

     0   :  { %vm7_vm0 = vcmask 130048   ;;  %vm13_vm1 = vcmask 261248   ;;  %s39_s0 = inlined_call_operand.vmem [shape: s32[2,16], index: 0, kind: input, shape index: {}]   ;;  %s40_s1 = inlined_call_operand.vmem [shape: s32[32], index: 1, kind: output, shape index: {}]  }
   0x1   :  { %v4_v0 = vld [vmem:[%s39_s0] sm:$0x3]  ;;  %s22_s0 = smov 16  }
   0x2   :  { %5 = vst [vmem:[#allocation1] sm:$0x3] %v4_v0 }
   0x9   :  { %v10_v1 = vld [vmem:[#allocation1 + $0x1] sm:$0x1]   ;;  %v6_v2 = vld [vmem:[#allocation1] sm:$0x1]  }
   0xa   :  { %11 = vrot.lane.b32.xlu0 %v10_v1, %s22_s0  ;;  %8 = vst.msk [vmem:[#allocation0] sm:$0x1] %vm7_vm0, %v6_v2  }
  0x7c   :  { %v12_v3 = vpop.permute.xlu0 %11  }
  0x7d   :  { %14 = vst.msk [vmem:[#allocation0] sm:$0x1] %vm13_vm1, %v12_v3  }
  0x84   :  { %v18_v4 = vld [vmem:[#allocation0] sm:$0x1] }
  0x85   :  { %20 = vst [vmem:[%s40_s1] sm:$0x1] %v18_v4 }

// kernel: base_model_forward.1
= control target key start
LH: loop header
LB: loop body
LE: loop exit
PB: predicated region body
PF: predicated region fallthrough
CT: control target
= control target key end

     0   :  { %v1180_v2 = vmov 0   ;;  %vm125_vm0 = vcmask 130048   ;;  %s1515_s0 = inlined_call_operand.vmem [shape: bf16[48,16], index: 0, kind: input, shape index: {}]   ;;  %s1516_s1 = inlined_call_operand.vmem [shape: bf16[48,48], index: 1, kind: input, shape index: {}]   ;;  %s1517_s2 = inlined_call_operand.vmem [shape: bf16[544,256], index: 2, kind: input, shape index: {}]   ;;  %s1518_s3 = inlined_call_operand.vmem [shape: bf16[32,64], index: 3, kind: input, shape index: {}]   ;;  %s1519_s4 = inlined_call_operand.hbm [shape: f32[32,128], index: 4, kind: output, shape index: {}]  }
   0x1   :  { %v1049_v0 = vld [vmem:[%s1517_s2 + $0x4] ss:$8 sps:$4 sm:$0xff]   ;;  %v1051_v1 = vld [vmem:[%s1517_s2] ss:$8 sps:$4 sm:$0xff]   ;;  %167 = vmatprep.mubr.bf16.mxu0 %v1180_v2  ;;  %v1055_v4 = vld [vmem:[%s1517_s2 + $0x14] ss:$8 sps:$4 sm:$0xff]  }
   0x2   :  { %135 = vmatprep.subr.bf16.mxu0 %v1049_v0  ;;  %v1052_v3 = vld [vmem:[%s1515_s0] sm:$0xff]   ;;  %v1057_v5 = vld [vmem:[%s1517_s2 + $0x10] ss:$8 sps:$4 sm:$0xff]   ;;  %364 = vmatprep.subr.bf16.mxu1 %v1055_v4  ;;  %v1061_v8 = vld [vmem:[%s1517_s2 + $0x34] ss:$8 sps:$4 sm:$0xff]  }
   0x3   :  { %136 = vmatpush1.bf16.msra.mxu0 %v1051_v1  ;;  %v1058_v6 = vld [vmem:[%s1517_s2 + $0x24] ss:$8 sps:$4 sm:$0xff]   ;;  %365 = vmatpush1.bf16.msra.mxu1 %v1057_v5  ;;  %v1060_v7 = vld [vmem:[%s1517_s2 + $0x20] ss:$8 sps:$4 sm:$0xff]   ;;  %v1063_v10 = vld [vmem:[%s1517_s2 + $0x30] ss:$8 sps:$4 sm:$0xff]  }
   0x4   :  { %366 = vmatprep.subr.bf16.mxu1 %v1058_v6  ;;  %v1053_v9 = vld [vmem:[%s1515_s0 + $0x8] sm:$0xff]   ;;  %v1067_v13 = vld [vmem:[%s1517_s2 + $0x54] ss:$8 sps:$4 sm:$0xff]   ;;  %v1069_v15 = vld [vmem:[%s1517_s2 + $0x50] ss:$8 sps:$4 sm:$0xff]  }
   0x5   :  { %v1064_v11 = vld [vmem:[%s1517_s2 + $0x44] ss:$8 sps:$4 sm:$0xff]   ;;  %v1066_v12 = vld [vmem:[%s1517_s2 + $0x40] ss:$8 sps:$4 sm:$0xff]   ;;  %v1054_v14 = vld [vmem:[%s1515_s0 + $0x10] sm:$0xff]  }
   0x6   :  { %947 = vmatmul.mubr.msk.bf16.vlgmr.msra.gmra.mrb[0].mxu0 %vm125_vm0, %v1052_v3  ;;  %v1070_v16 = vld [vmem:[%s1517_s2 + $0x64] ss:$8 sps:$4 sm:$0xff]   ;;  %v1072_v17 = vld [vmem:[%s1517_s2 + $0x60] ss:$8 sps:$4 sm:$0xff]   ;;  %v1073_v18 = vld [vmem:[%s1517_s2 + $0x74] ss:$8 sps:$4 sm:$0xff]  }
   0x7   :  { %177 = vmatprep.mubr.bf16.mxu0 %v1180_v2  ;;  %367 = vmatpush1.bf16.msra.mxu1 %v1060_v7  ;;  %v1075_v19 = vld [vmem:[%s1517_s2 + $0x70] ss:$8 sps:$4 sm:$0xff]   ;;  %v1076_v20 = vld [vmem:[%s1517_s2 + $0x84] ss:$8 sps:$4 sm:$0xff]   ;;  %v1078_v21 = vld [vmem:[%s1517_s2 + $0x80] ss:$8 sps:$4 sm:$0xff]  }
   0x8   :  { %368 = vmatprep.subr.bf16.mxu1 %v1061_v8  ;;  %v1079_v22 = vld [vmem:[%s1517_s2 + $0x94] ss:$8 sps:$4 sm:$0xff]   ;;  %v1081_v23 = vld [vmem:[%s1517_s2 + $0x90] ss:$8 sps:$4 sm:$0xff]   ;;  %v1082_v24 = vld [vmem:[%s1517_s2 + $0xa4] ss:$8 sps:$4 sm:$0xff]  }
   0xb   :  { %369 = vmatpush1.bf16.msra.mxu1 %v1063_v10 }
   0xc   :  { %370 = vmatprep.subr.bf16.mxu1 %v1064_v11 }
   0xe   :  { %948 = vmatmul.mubr.msk.bf16.gmra.mrb[4].mxu0 %vm125_vm0, %v1053_v9 }
   0xf   :  { %187 = vmatprep.mubr.bf16.mxu0 %v1180_v2  ;;  %371 = vmatpush1.bf16.msra.mxu1 %v1066_v12 }
  0x10   :  { %372 = vmatprep.subr.bf16.mxu1 %v1067_v13 }
  0x13   :  { %373 = vmatpush1.bf16.msra.mxu1 %v1069_v15 }
  0x14   :  { %374 = vmatprep.subr.bf16.mxu1 %v1070_v16 }
  0x16   :  { %949 = vmatmul.mubr.msk.bf16.gmra.mrb[8].mxu0 %vm125_vm0, %v1054_v14 }
  0x17   :  { %498 = vmatprep.mubr.bf16.mxu0 %v1180_v2  ;;  %375 = vmatpush1.bf16.msra.mxu1 %v1072_v17 }
  0x18   :  { %376 = vmatprep.subr.bf16.mxu1 %v1073_v18 }
  0x1b   :  { %377 = vmatpush1.bf16.msra.mxu1 %v1075_v19 }
  0x1c   :  { %378 = vmatprep.subr.bf16.mxu1 %v1076_v20 }
  0x1f   :  { %379 = vmatpush1.bf16.msra.mxu1 %v1078_v21 }
  0x20   :  { %380 = vmatprep.subr.bf16.mxu1 %v1079_v22 }
  0x21   :  { %9 = vsyncpa [#allocation3], 0  ;;  %v1084_v25 = vld [vmem:[%s1517_s2 + $0xa0] ss:$8 sps:$4 sm:$0xff]   ;;  %v1085_v26 = vld [vmem:[%s1517_s2 + $0xb4] ss:$8 sps:$4 sm:$0xff]  }
  0x22   :  { %v1087_v27 = vld [vmem:[%s1517_s2 + $0xb0] ss:$8 sps:$4 sm:$0xff]   ;;  %v1088_v28 = vld [vmem:[%s1517_s2 + $0xc4] ss:$8 sps:$4 sm:$0xff]   ;;  %v1090_v29 = vld [vmem:[%s1517_s2 + $0xc0] ss:$8 sps:$4 sm:$0xff]  }
  0x23   :  { %381 = vmatpush1.bf16.msra.mxu1 %v1081_v23  ;;  %v1091_v30 = vld [vmem:[%s1517_s2 + $0xd4] ss:$8 sps:$4 sm:$0xff]   ;;  %v1093_v31 = vld [vmem:[%s1517_s2 + $0xd0] ss:$8 sps:$4 sm:$0xff]   ;;  %v1094_v32 = vld [vmem:[%s1517_s2 + $0xe4] ss:$8 sps:$4 sm:$0xff]  }
  0x24   :  { %382 = vmatprep.subr.bf16.mxu1 %v1082_v24  ;;  %v1096_v33 = vld [vmem:[%s1517_s2 + $0xe0] ss:$8 sps:$4 sm:$0xff]   ;;  %v1097_v34 = vld [vmem:[%s1517_s2 + $0xf4] ss:$8 sps:$4 sm:$0xff]   ;;  %v1099_v35 = vld [vmem:[%s1517_s2 + $0xf0] ss:$8 sps:$4 sm:$0xff]  }
  0x25   :  { %v1100_v36 = vld [vmem:[%s1517_s2 + $0x104] ss:$8 sps:$4 sm:$0xff]   ;;  %v1102_v37 = vld [vmem:[%s1517_s2 + $0x100] ss:$8 sps:$4 sm:$0xff]   ;;  %v1108_v11 = vld [vmem:[%s1517_s2 + $0x114] ss:$8 sps:$4 sm:$0xff]  }
  0x26   :  { %v1349_v12 = vld [vmem:[%s1516_s1] sm:$0xff]   ;;  %vm456_vm1 = vcmask 392192   ;;  %v1106_v13 = vld [vmem:[%s1517_s2 + $0x110] ss:$8 sps:$4 sm:$0xff]   ;;  %v1114_v16 = vld [vmem:[%s1517_s2 + $0x134] ss:$8 sps:$4 sm:$0xff]  }
  0x27   :  { %383 = vmatpush1.bf16.msra.mxu1 %v1084_v25  ;;  %v1111_v14 = vld [vmem:[%s1517_s2 + $0x124] ss:$8 sps:$4 sm:$0xff]   ;;  %v1109_v15 = vld [vmem:[%s1517_s2 + $0x120] ss:$8 sps:$4 sm:$0xff]   ;;  %v1112_v18 = vld [vmem:[%s1517_s2 + $0x130] ss:$8 sps:$4 sm:$0xff]  }
  0x28   :  { %384 = vmatprep.subr.bf16.mxu1 %v1085_v26  ;;  %v1369_v17 = vld [vmem:[%s1516_s1 + $0x8] sm:$0xff]   ;;  %v1120_v21 = vld [vmem:[%s1517_s2 + $0x154] ss:$8 sps:$4 sm:$0xff]   ;;  %v1118_v23 = vld [vmem:[%s1517_s2 + $0x150] ss:$8 sps:$4 sm:$0xff]   ;;  %vm858_vm2 = vcmask 523264  }
  0x29   :  { %v1117_v19 = vld [vmem:[%s1517_s2 + $0x144] ss:$8 sps:$4 sm:$0xff]   ;;  %v1115_v20 = vld [vmem:[%s1517_s2 + $0x140] ss:$8 sps:$4 sm:$0xff]   ;;  %v1389_v22 = vld [vmem:[%s1516_s1 + $0x10] sm:$0xff]   ;;  %s1181_s27 = smov [#allocation2]  }
  0x2a   :  { %v1123_v24 = vld [vmem:[%s1517_s2 + $0x164] ss:$8 sps:$4 sm:$0xff]   ;;  %v1121_v25 = vld [vmem:[%s1517_s2 + $0x160] ss:$8 sps:$4 sm:$0xff]   ;;  %v1126_v26 = vld [vmem:[%s1517_s2 + $0x174] ss:$8 sps:$4 sm:$0xff]  }
  0x2b   :  { %385 = vmatpush1.bf16.msra.mxu1 %v1087_v27  ;;  %v1124_v27 = vld [vmem:[%s1517_s2 + $0x170] ss:$8 sps:$4 sm:$0xff]   ;;  %s931_s28 = sshll.u32 %s1181_s27, 4  ;;  %s932_s28 = int_to_ptr.vmem [resolvable:$true] %s931_s28 }
  0x2c   :  { %386 = vmatprep.subr.bf16.mxu1 %v1088_v28  ;;  %v1129_v28 = vld [vmem:[%s1517_s2 + $0x184] ss:$8 sps:$4 sm:$0xff]   ;;  %p1161_p1 = scmp.lt.s32.totalorder %s932_s28, %s932_s28 }
  0x2f   :  { %387 = vmatpush1.bf16.msra.mxu1 %v1090_v29  ;;  %v1127_v29 = vld [vmem:[%s1517_s2 + $0x180] ss:$8 sps:$4 sm:$0xff]  }
  0x30   :  { %388 = vmatprep.subr.bf16.mxu1 %v1091_v30  ;;  %v1132_v30 = vld [vmem:[%s1517_s2 + $0x194] ss:$8 sps:$4 sm:$0xff]  }
  0x33   :  { %389 = vmatpush1.bf16.msra.mxu1 %v1093_v31  ;;  %v1130_v31 = vld [vmem:[%s1517_s2 + $0x190] ss:$8 sps:$4 sm:$0xff]  }
  0x34   :  { %390 = vmatprep.subr.bf16.mxu1 %v1094_v32  ;;  %v1135_v32 = vld [vmem:[%s1517_s2 + $0x1a4] ss:$8 sps:$4 sm:$0xff]  }
  0x37   :  { %391 = vmatpush1.bf16.msra.mxu1 %v1096_v33  ;;  %v1133_v33 = vld [vmem:[%s1517_s2 + $0x1a0] ss:$8 sps:$4 sm:$0xff]  }
  0x38   :  { %392 = vmatprep.subr.bf16.mxu1 %v1097_v34  ;;  %v1138_v34 = vld [vmem:[%s1517_s2 + $0x1b4] ss:$8 sps:$4 sm:$0xff]  }
  0x3b   :  { %393 = vmatpush1.bf16.msra.mxu1 %v1099_v35  ;;  %v1136_v35 = vld [vmem:[%s1517_s2 + $0x1b0] ss:$8 sps:$4 sm:$0xff]  }
  0x3c   :  { %394 = vmatprep.subr.bf16.mxu1 %v1100_v36  ;;  %v1141_v36 = vld [vmem:[%s1517_s2 + $0x1c4] ss:$8 sps:$4 sm:$0xff]  }
  0x3f   :  { %395 = vmatpush1.bf16.msra.mxu1 %v1102_v37  ;;  %v1139_v37 = vld [vmem:[%s1517_s2 + $0x1c0] ss:$8 sps:$4 sm:$0xff]  }
  0xd9   :  { %v169_v38 = vpop.f32.mrb[0].mxu0 }
  0xda   :  { %v171_v39 = vpop.f32.mrb[1].mxu0 }
  0xdb   :  { %v173_v40 = vpop.f32.mrb[2].mxu0 }
  0xdc   :  { %v1327_v41 = vpack.c.bf16 %v173_v40, %v169_v38  ;;  %v175_v42 = vpop.f32.mrb[3].mxu0  ;;  %v1144_v38 = vld [vmem:[%s1517_s2 + $0x1d4] ss:$8 sps:$4 sm:$0xff]   ;;  %v1147_v40 = vld [vmem:[%s1517_s2 + $0x1e4] ss:$8 sps:$4 sm:$0xff]  }
  0xdd   :  { %v199_v43 = vpack.c.bf16 %v175_v42, %v171_v39  ;;  %v1142_v39 = vld [vmem:[%s1517_s2 + $0x1d0] ss:$8 sps:$4 sm:$0xff]   ;;  %v1145_v42 = vld [vmem:[%s1517_s2 + $0x1e0] ss:$8 sps:$4 sm:$0xff]  }
  0xdf   :  { %396 = vmatprep.mubr.bf16.mxu1 %v199_v43  ;;  %v1150_v43 = vld [vmem:[%s1517_s2 + $0x1f4] ss:$8 sps:$4 sm:$0xff]  }
  0xe0   :  { %397 = vmatmul.mubr.bf16.vlgmr.msra.gmra.mrb[0].mxu1 %v1327_v41 }
  0xe1   :  { %v179_v44 = vpop.f32.mrb[4].mxu0 }
  0xe2   :  { %v1330_v45 = vpop.f32.mrb[5].mxu0 }
  0xe3   :  { %v183_v46 = vpop.f32.mrb[6].mxu0 }
  0xe4   :  { %v200_v47 = vpack.c.bf16 %v183_v46, %v179_v44  ;;  %v1332_v48 = vpop.f32.mrb[7].mxu0  ;;  %v1148_v44 = vld [vmem:[%s1517_s2 + $0x1f0] ss:$8 sps:$4 sm:$0xff]   ;;  %v1153_v46 = vld [vmem:[%s1517_s2 + $0x204] ss:$8 sps:$4 sm:$0xff]  }
  0xe5   :  { %v201_v49 = vpack.c.bf16 %v1332_v48, %v1330_v45 }
  0xe7   :  { %406 = vmatprep.mubr.bf16.mxu1 %v201_v49  ;;  %v433_v49 = vlaneseq }
  0xe8   :  { %407 = vmatmul.mubr.bf16.gmra.mrb[4].mxu1 %v200_v47  ;;  %v1151_v47 = vld [vmem:[%s1517_s2 + $0x200] ss:$8 sps:$4 sm:$0xff]  }
  0xe9   :  { %v189_v50 = vpop.f32.mrb[8].mxu0 }
  0xea   :  { %v1336_v51 = vpop.f32.mrb[9].mxu0 }
  0xeb   :  { %v193_v52 = vpop.f32.mrb[10].mxu0 }
  0xec   :  { %v202_v53 = vpack.c.bf16 %v193_v52, %v189_v50  ;;  %v1338_v54 = vpop.f32.mrb[11].mxu0  ;;  %v1462_v50 = vshrl.u32 %v433_v49, 7  ;;  %v1467_v52 = vld [vmem:[%s1517_s2 + $0x210] sm:$0x11] }
  0xed   :  { %v203_v55 = vpack.c.bf16 %v1338_v54, %v1336_v51 }
  0xef   :  { %416 = vmatprep.mubr.bf16.mxu1 %v203_v55  ;;  %v435_v55 = vsub.s32 0, %v1462_v50 }
  0xf0   :  { %417 = vmatmul.mubr.bf16.gmra.mrb[8].mxu1 %v202_v53  ;;  %v98_v53 = vunpack.c.l.bf16 %v1467_v52 }
  0xf1   :  { %816 = vmatprep.mubr.bf16.mxu1 %v1180_v2 }
 0x1b3   :  { %v398_v56 = vpop.f32.mrb[0].mxu1 }
 0x1b4   :  { %v400_v57 = vpop.f32.mrb[1].mxu1 }
 0x1b5   :  { %v402_v58 = vpop.f32.mrb[2].mxu1 }
 0x1b6   :  { %v427_v59 = vpack.c.bf16 %v402_v58, %v398_v56  ;;  %v404_v60 = vpop.f32.mrb[3].mxu1  ;;  %v99_v56 = vunpack.c.h.bf16 %v1467_v52 }
 0x1b7   :  { %v428_v61 = vpack.c.bf16 %v404_v60, %v400_v57  ;;  %v436_v57 = vrot.slane %v98_v53, %v435_v55 }
 0x1b8   :  { %v440_v58 = vrot.slane %v99_v56, %v435_v55 }
 0x1b9   :  { %466 = vmatprep.subr.bf16.mxu0 %v428_v61 }
 0x1ba   :  { %467 = vmatpush1.bf16.msra.mxu0 %v427_v59 }
 0x1bb   :  { %v408_v62 = vpop.f32.mrb[4].mxu1 }
 0x1bc   :  { %v410_v63 = vpop.f32.mrb[5].mxu1 }
 0x1bd   :  { %v412_v0 = vpop.f32.mrb[6].mxu1 }
 0x1be   :  { %v429_v1 = vpack.c.bf16 %v412_v0, %v408_v62  ;;  %v414_v3 = vpop.f32.mrb[7].mxu1 }
 0x1bf   :  { %v430_v4 = vpack.c.bf16 %v414_v3, %v410_v63 }
 0x1c1   :  { %468 = vmatprep.subr.bf16.mxu0 %v430_v4 }
 0x1c2   :  { %469 = vmatpush1.bf16.msra.mxu0 %v429_v1 }
 0x1c3   :  { %v418_v5 = vpop.f32.mrb[8].mxu1 }
 0x1c4   :  { %v420_v6 = vpop.f32.mrb[9].mxu1 }
 0x1c5   :  { %v422_v7 = vpop.f32.mrb[10].mxu1 }
 0x1c6   :  { %v431_v8 = vpack.c.bf16 %v422_v7, %v418_v5  ;;  %v424_v9 = vpop.f32.mrb[11].mxu1 }
 0x1c7   :  { %v432_v10 = vpack.c.bf16 %v424_v9, %v420_v6 }
 0x1c9   :  { %470 = vmatprep.subr.bf16.mxu0 %v432_v10 }
 0x1ca   :  { %471 = vmatpush1.bf16.msra.mxu0 %v431_v8 }
 0x1cb   :  { %707 = vmatprep.subr.bf16.mxu0 %v1108_v11 }
 0x1cd   :  { %985 = vmatmul.mubr.msk.bf16.vlgmr.msra.gmra.mrb[12].mxu0 %vm456_vm1, %v1349_v12 }
 0x1ce   :  { %508 = vmatprep.mubr.bf16.mxu0 %v1180_v2  ;;  %708 = vmatpush1.bf16.msra.mxu0 %v1106_v13 }
 0x1cf   :  { %709 = vmatprep.subr.bf16.mxu0 %v1111_v14 }
 0x1d2   :  { %710 = vmatpush1.bf16.msra.mxu0 %v1109_v15 }
 0x1d3   :  { %711 = vmatprep.subr.bf16.mxu0 %v1114_v16 }
 0x1d5   :  { %986 = vmatmul.mubr.msk.bf16.gmra.mrb[16].mxu0 %vm456_vm1, %v1369_v17 }
 0x1d6   :  { %518 = vmatprep.mubr.bf16.mxu0 %v1180_v2  ;;  %712 = vmatpush1.bf16.msra.mxu0 %v1112_v18 }
 0x1d7   :  { %713 = vmatprep.subr.bf16.mxu0 %v1117_v19 }
 0x1da   :  { %714 = vmatpush1.bf16.msra.mxu0 %v1115_v20 }
 0x1db   :  { %715 = vmatprep.subr.bf16.mxu0 %v1120_v21 }
 0x1dd   :  { %987 = vmatmul.mubr.msk.bf16.gmra.mrb[20].mxu0 %vm456_vm1, %v1389_v22 }
 0x1de   :  { %716 = vmatpush1.bf16.msra.mxu0 %v1118_v23 }
 0x1df   :  { %717 = vmatprep.subr.bf16.mxu0 %v1123_v24 }
 0x1e2   :  { %718 = vmatpush1.bf16.msra.mxu0 %v1121_v25 }
 0x1e3   :  { %719 = vmatprep.subr.bf16.mxu0 %v1126_v26 }
 0x1e6   :  { %720 = vmatpush1.bf16.msra.mxu0 %v1124_v27 }
 0x1e7   :  { %721 = vmatprep.subr.bf16.mxu0 %v1129_v28 }
 0x1ea   :  { %722 = vmatpush1.bf16.msra.mxu0 %v1127_v29 }
 0x1eb   :  { %723 = vmatprep.subr.bf16.mxu0 %v1132_v30 }
 0x1ee   :  { %724 = vmatpush1.bf16.msra.mxu0 %v1130_v31 }
 0x1ef   :  { %725 = vmatprep.subr.bf16.mxu0 %v1135_v32 }
 0x1f2   :  { %726 = vmatpush1.bf16.msra.mxu0 %v1133_v33 }
 0x1f3   :  { %727 = vmatprep.subr.bf16.mxu0 %v1138_v34 }
 0x1f6   :  { %728 = vmatpush1.bf16.msra.mxu0 %v1136_v35 }
 0x1f7   :  { %729 = vmatprep.subr.bf16.mxu0 %v1141_v36 }
 0x1fa   :  { %730 = vmatpush1.bf16.msra.mxu0 %v1139_v37 }
 0x1fb   :  { %731 = vmatprep.subr.bf16.mxu0 %v1144_v38 }
 0x1fe   :  { %732 = vmatpush1.bf16.msra.mxu0 %v1142_v39 }
 0x1ff   :  { %733 = vmatprep.subr.bf16.mxu0 %v1147_v40 }
 0x202   :  { %734 = vmatpush1.bf16.msra.mxu0 %v1145_v42 }
 0x203   :  { %735 = vmatprep.subr.bf16.mxu0 %v1150_v43 }
 0x206   :  { %736 = vmatpush1.bf16.msra.mxu0 %v1148_v44 }
 0x207   :  { %737 = vmatprep.subr.bf16.mxu0 %v1153_v46 }
 0x20a   :  { %738 = vmatpush1.bf16.msra.mxu0 %v1151_v47 }
 0x2a0   :  { %v500_v59 = vpop.f32.mrb[12].mxu0 }
 0x2a1   :  { %v501_v60 = vadd.f32 %v500_v59, %v436_v57  ;;  %v502_v61 = vpop.f32.mrb[13].mxu0 }
 0x2a2   :  { %v503_v62 = vadd.f32 %v502_v61, %v440_v58  ;;  %v504_v63 = vpop.f32.mrb[14].mxu0 }
 0x2a3   :  { %v505_v0 = vadd.f32 %v504_v63, %v436_v57  ;;  %v506_v1 = vpop.f32.mrb[15].mxu0  ;;  %v529_v4 = vmax.f32 %v501_v60, 0.0 }
 0x2a4   :  { %v507_v3 = vadd.f32 %v506_v1, %v440_v58  ;;  %v530_v6 = vmax.f32 %v503_v62, 0.0 }
 0x2a5   :  { %v531_v5 = vmax.f32 %v505_v0, 0.0 }
 0x2a6   :  { %v532_v7 = vmax.f32 %v507_v3, 0.0 }
 0x2a7   :  { %v541_v8 = vpack.c.bf16 %v531_v5, %v529_v4  ;;  %v1154_v5 = vld [vmem:[%s1518_s3] sm:$0xff]  }
 0x2a8   :  { %v542_v9 = vpack.c.bf16 %v532_v7, %v530_v6  ;;  %v510_v10 = vpop.f32.mrb[16].mxu0  ;;  %v778_v6 = vsub.s32 1, %v1462_v50 }
 0x2a9   :  { %v511_v11 = vadd.f32 %v510_v10, %v436_v57  ;;  %v512_v13 = vpop.f32.mrb[17].mxu0 }
 0x2aa   :  { %v513_v14 = vadd.f32 %v512_v13, %v440_v58  ;;  %v514_v15 = vpop.f32.mrb[18].mxu0  ;;  %739 = vmatprep.mubr.bf16.mxu0 %v542_v9 }
 0x2ab   :  { %v515_v16 = vadd.f32 %v514_v15, %v436_v57  ;;  %v516_v18 = vpop.f32.mrb[19].mxu0  ;;  %740 = vmatmul.mubr.bf16.vlgmr.msra.gmra.mrb[24].mxu0 %v541_v8  ;;  %v533_v20 = vmax.f32 %v511_v11, 0.0 }
 0x2ac   :  { %v517_v19 = vadd.f32 %v516_v18, %v440_v58  ;;  %v534_v23 = vmax.f32 %v513_v14, 0.0 }
 0x2ad   :  { %v535_v21 = vmax.f32 %v515_v16, 0.0 }
 0x2ae   :  { %v536_v24 = vmax.f32 %v517_v19, 0.0 }
 0x2af   :  { %v543_v25 = vpack.c.bf16 %v535_v21, %v533_v20 }
 0x2b0   :  { %v544_v26 = vpack.c.bf16 %v536_v24, %v534_v23  ;;  %v520_v27 = vpop.f32.mrb[20].mxu0 }
 0x2b1   :  { %v521_v28 = vadd.f32 %v520_v27, %v436_v57  ;;  %v522_v29 = vpop.f32.mrb[21].mxu0 }
 0x2b2   :  { %v523_v30 = vadd.f32 %v522_v29, %v440_v58  ;;  %v524_v31 = vpop.f32.mrb[22].mxu0  ;;  %749 = vmatprep.mubr.bf16.mxu0 %v544_v26 }
 0x2b3   :  { %v525_v32 = vadd.f32 %v524_v31, %v436_v57  ;;  %v526_v33 = vpop.f32.mrb[23].mxu0  ;;  %750 = vmatmul.mubr.bf16.gmra.mrb[28].mxu0 %v543_v25  ;;  %v537_v35 = vmax.f32 %v521_v28, 0.0 }
 0x2b4   :  { %v527_v34 = vadd.f32 %v526_v33, %v440_v58  ;;  %v538_v37 = vmax.f32 %v523_v30, 0.0 }
 0x2b5   :  { %v539_v36 = vmax.f32 %v525_v32, 0.0 }
 0x2b6   :  { %v540_v38 = vmax.f32 %v527_v34, 0.0 }
 0x2b7   :  { %v545_v39 = vpack.c.bf16 %v539_v36, %v537_v35 }
 0x2b8   :  { %v546_v40 = vpack.c.bf16 %v540_v38, %v538_v37 }
 0x2ba   :  { %759 = vmatprep.mubr.bf16.mxu0 %v546_v40 }
 0x2bb   :  { %760 = vmatmul.mubr.bf16.gmra.mrb[32].mxu0 %v545_v39 }
 0x37e   :  { %v741_v42 = vpop.f32.mrb[24].mxu0 }
 0x37f   :  { %v743_v43 = vpop.f32.mrb[25].mxu0 }
 0x380   :  { %v745_v44 = vpop.f32.mrb[26].mxu0 }
 0x381   :  { %v770_v46 = vpack.c.bf16 %v745_v44, %v741_v42  ;;  %v747_v47 = vpop.f32.mrb[27].mxu0 }
 0x382   :  { %v771_v49 = vpack.c.bf16 %v747_v47, %v743_v43 }
 0x384   :  { %784 = vmatprep.subr.bf16.mxu1 %v771_v49 }
 0x385   :  { %785 = vmatpush1.bf16.msra.mxu1 %v770_v46 }
 0x386   :  { %v751_v55 = vpop.f32.mrb[28].mxu0 }
 0x387   :  { %v753_v57 = vpop.f32.mrb[29].mxu0 }
 0x388   :  { %v755_v59 = vpop.f32.mrb[30].mxu0 }
 0x389   :  { %v772_v58 = vpack.c.bf16 %v755_v59, %v751_v55  ;;  %v757_v60 = vpop.f32.mrb[31].mxu0 }
 0x38a   :  { %v773_v61 = vpack.c.bf16 %v757_v60, %v753_v57 }
 0x38c   :  { %786 = vmatprep.subr.bf16.mxu1 %v773_v61 }
 0x38d   :  { %787 = vmatpush1.bf16.msra.mxu1 %v772_v58 }
 0x38e   :  { %v761_v62 = vpop.f32.mrb[32].mxu0 }
 0x38f   :  { %v763_v63 = vpop.f32.mrb[33].mxu0 }
 0x390   :  { %v765_v0 = vpop.f32.mrb[34].mxu0 }
 0x391   :  { %v774_v1 = vpack.c.bf16 %v765_v0, %v761_v62  ;;  %v767_v3 = vpop.f32.mrb[35].mxu0 }
 0x392   :  { %v775_v4 = vpack.c.bf16 %v767_v3, %v763_v63 }
 0x394   :  { %788 = vmatprep.subr.bf16.mxu1 %v775_v4 }
 0x395   :  { %789 = vmatpush1.bf16.msra.mxu1 %v774_v1 }
 0x398   :  { %1020 = vmatmul.mubr.msk.bf16.vlgmr.msra.gmra.mrb[12].mxu1 %vm456_vm1, %v1349_v12  ;;  %v779_v12 = vrot.slane %v98_v53, %v778_v6 }
 0x399   :  { %824 = vmatprep.mubr.bf16.mxu1 %v1180_v2 }
 0x3a0   :  { %1021 = vmatmul.mubr.msk.bf16.gmra.mrb[16].mxu1 %vm456_vm1, %v1369_v17 }
 0x3a1   :  { %832 = vmatprep.mubr.bf16.mxu1 %v1180_v2 }
 0x3a8   :  { %1022 = vmatmul.mubr.msk.bf16.gmra.mrb[20].mxu1 %vm456_vm1, %v1389_v22  ;;  %v783_v22 = vrot.slane %v99_v56, %v778_v6 }
 0x3a9   :  { %1041 = vmatprep.mubr.msk.bf16.mxu1 %vm858_vm2, %v1154_v5 }
 0x46b   :  { %v818_v7 = vpop.f32.mrb[12].mxu1 }
 0x46c   :  { %v820_v8 = vpop.f32.mrb[13].mxu1  ;;  %v819_v9 = vadd.f32 %v818_v7, %v779_v12 }
 0x46d   :  { %v821_v17 = vpop.f32.mrb[14].mxu1 }
 0x46e   :  { %v822_v2 = vadd.f32 %v821_v17, %v779_v12  ;;  %v823_v10 = vpop.f32.mrb[15].mxu1 }
 0x470   :  { %v843_v11 = vpack.c.bf16 %v822_v2, %v819_v9 }
 0x473   :  { %v826_v13 = vpop.f32.mrb[16].mxu1 }
 0x474   :  { %v827_v14 = vpop.f32.mrb[17].mxu1 }
 0x475   :  { %v828_v15 = vadd.f32 %v827_v14, %v783_v22  ;;  %v829_v16 = vpop.f32.mrb[18].mxu1 }
 0x476   :  { %v830_v18 = vpop.f32.mrb[19].mxu1 }
 0x477   :  { %v831_v19 = vadd.f32 %v830_v18, %v783_v22  ;;  %v914_v50 = vadd.f32 %v828_v15, %v1330_v45  ;;  %v1155_v45 = vld [vmem:[%s1518_s3 + $0x8] sm:$0xff]   ;;  %s1156_s3 = scalar_lea.vmem %s932_s28, 512 }
 0x478   :  { %p1157_p0 = scmp.ne.s32.totalorder %s932_s28, %s1156_s3  ;;  %p1162_p2 = scmp.lt.s32.totalorder %s1156_s3, %s1156_s3 }
 0x479   :  { %v841_v20 = vpack.c.bf16 %v831_v19, %v828_v15  ;;  %v915_v53 = vadd.f32 %v831_v19, %v1332_v48 }
 0x47a   :  { %p1163_p3 = por %p1162_p2, %p1161_p1 }
 0x47b   :  { %v834_v21 = vpop.f32.mrb[20].mxu1  ;;  %1033 = vmatprep.subr.bf16.mxu1 %v841_v20 }
 0x47c   :  { %v835_v23 = vpop.f32.mrb[21].mxu1  ;;  %1034 = vmatpush3.bf16.msra.mxu1 %v841_v20  ;;  %p1164_p4 = pnand %p1163_p3, %p1157_p0 }
 0x47d   :  { %v836_v24 = vadd.f32 %v835_v23, %v783_v22  ;;  %v837_v25 = vpop.f32.mrb[22].mxu1 }
 0x47e   :  { %v838_v26 = vpop.f32.mrb[23].mxu1 }
 0x47f   :  { %v839_v52 = vadd.f32 %v838_v26, %v783_v22  ;;  %v916_v56 = vadd.f32 %v836_v24, %v1336_v51 }
 0x481   :  { %v842_v27 = vpack.c.bf16 %v839_v52, %v836_v24  ;;  %v917_v28 = vadd.f32 %v839_v52, %v1338_v54 }
 0x483   :  { %1035 = vmatprep.subr.bf16.mxu1 %v842_v27 }
 0x484   :  { %1036 = vmatpush3.bf16.msra.mxu1 %v842_v27 }
 0x485   :  { %1037 = vmatprep.subr.bf16.mxu1 %v843_v11 }
 0x488   :  { %1038 = vmatpush3.bf16.msra.mxu1 %v843_v11 }
 0x489   :  { %1039 = vmatprep.subr.bf16.mxu1 %v1327_v41 }
 0x48c   :  { %1040 = vmatpush3.bf16.msra.mxu1 %v1327_v41 }
 0x48f   :  { %1042 = vmatmul.mubr.msk.bf16.vlgmr.msra.gmra.mrb[24].mxu1 %vm858_vm2, %v1155_v45 }
 0x562   :  { %v1043_v48 = vpop.f32.mrb[24].mxu1 }
 0x563   :  { %v920_v51 = vadd.f32 %v1043_v48, %v916_v56  ;;  %v899_v29 = vpop.f32.mrb[25].mxu1 }
 0x564   :  { %v918_v54 = vadd.f32 %v914_v50, %v899_v29  ;;  %v1044_v30 = vpop.f32.mrb[26].mxu1 }
 0x565   :  { %924 = vst [vmem:[#allocation2 + $0x10] sm:$0xff] %v920_v51  ;;  %v921_v31 = vadd.f32 %v1044_v30, %v917_v28  ;;  %v902_v32 = vpop.f32.mrb[27].mxu1 }
 0x566   :  { %922 = vst [vmem:[#allocation2] sm:$0xff] %v918_v54  ;;  %v919_v33 = vadd.f32 %v915_v53, %v902_v32 }
 0x567   :  { %925 = vst [vmem:[#allocation2 + $0x18] sm:$0xff] %v921_v31 }
 0x568   :  { %923 = vst [vmem:[#allocation2 + $0x8] sm:$0xff] %v919_v33 }
 0x569   :  { %1167 = shalt.err (!%p1164_p4)
}
 0x56a   :  { %s1168_s5 = scalar_lea.hbm %s1519_s4, 512 }
 0x56b   :  { %p1169_p5 = scmp.ne.s32.totalorder %s1519_s4, %s1168_s5  ;;  %p1172_p6 = scmp.lt.u32.totalorder %s1168_s5, %s1519_s4 }
 0x56d   :  { %p1174_p7 = pnand %p1172_p6, %p1169_p5 }
 0x56f   :  { %1177 = shalt.err (!%p1174_p7)
}
 0x570   :  { %s1182_s10 = smov 128   ;;  %s1183_s11 = smov 8  }
 0x571   :  { %937 = dma.vmem_to_hbm [thread:$0]  %s932_s28, 512, %s1519_s4, [#allocation3], %s1182_s10, %s1182_s10, %s1183_s11  }
 0x572   :  { %1178 = dma.done.wait [#allocation3], 512  }
 0x573   :  { %1179 = vsyncadd [#allocation3], 4294966784 }
 0x574   :  { %941 = vsyncpa [#allocation3], 1 }

</bundles_post_ra>
